<compile_context>
chip_gen: v6e
topology: v6e:2x2x1
jax: 0.10.0
libtpu: 0.0.40
codegen_flags: <defaults>
</compile_context>

<pallas_src>
import functools

import jax
import jax.numpy as jnp
from jax import lax
from jax.experimental import pallas as pl
from jax.experimental.pallas import tpu as pltpu


def _round_up(v, m):
    return (v + m - 1) // m * m


def rnn_kernel(x_ref, p_ref, out_ref, xwb_ref, *, input_size, hidden_size,
               output_size, offsets, unroll_limit=64):
    """One batch-block of the full forward pass.

    x_ref   : (Bb, T)     if input_size == 1 (dense 2-D, no degenerate lane dim)
              (Bb, T, I)  otherwise
    p_ref   : (rows, H)   packed parameter slab (all offsets multiples of 8):
                rows[off_whh : off_whh+H] = W_hh^T
                rows[off_wih : off_wih+I] = W_ih^T
                rows[off_b]               = b_ih + b_hh
                rows[off_wfc : off_wfc+O] = W_fc
                rows[off_bfc, :O]         = b_fc
    out_ref : (Bb, O)
    xwb_ref : (T, Bb, H) f32 scratch — time-major hoisted projection + bias.
    """
    I, H, O = input_size, hidden_size, output_size
    off_whh, off_wih, off_b, off_wfc, off_bfc = offsets
    T = xwb_ref.shape[0]

    whh = p_ref[off_whh:off_whh + H, :]          # (H, H) = W_hh^T
    bias = p_ref[off_b:off_b + 1, :]             # (1, H) = b_ih + b_hh

    # ---- Hoisted input projection for ALL time steps, time-major layout --------
    if I == 1:
        # One-time (Bb, T) -> (T, Bb) transpose (off the serial chain), then a
        # single VPU broadcast-multiply; the K=1 "matmul" never touches the MXU.
        x_tb = jnp.transpose(x_ref[...])                                # (T, Bb)
        wih_row = p_ref[off_wih:off_wih + 1, :]                         # (1, H)
        xwb = x_tb[:, :, None] * wih_row[None, :, :] + bias[None, :, :]
    else:
        wih = p_ref[off_wih:off_wih + I, :]                             # (I, H)
        xwb = jnp.einsum("bti,ih->tbh", x_ref[...], wih,
                         preferred_element_type=jnp.float32) + bias[None, :, :]
    xwb_ref[...] = xwb.astype(jnp.float32)

    # ---- Serial recurrence: one small (Bb,H)@(H,H) MXU matmul + tanh per step ---
    # t = 0: h_{-1} == 0, so the recurrent matmul vanishes.
    h = jnp.tanh(xwb_ref[0])                                            # (Bb, H)

    def step(t, h):
        # NOTE: W_hh is identical every step; if a bundle dump shows a per-step
        # RHS re-push, pltpu.matmul_push_rhs / matmul_acc_lhs / matmul_pop would
        # keep it resident in the MXU (biggest relative win on v5e).
        return jnp.tanh(xwb_ref[t] +
                        jnp.dot(h, whh, preferred_element_type=jnp.float32))

    if T <= unroll_limit:
        # Full static unroll: maximal scheduler visibility at small T.
        for t in range(1, T):
            h = step(t, h)
    else:
        # Bounded code size / vreg pressure at long T.
        h = lax.fori_loop(1, T, step, h, unroll=8)

    # ---- Final Linear on the last hidden state ---------------------------------
    wfc = p_ref[off_wfc:off_wfc + O, :]                                 # (O, H)
    bfc = p_ref[off_bfc:off_bfc + 1, :][:, :O]                          # (1, O)
    if O == 1:
        # O=1 matmul is degenerate on the MXU; VPU multiply + lane reduce instead.
        out = jnp.sum(h * wfc, axis=-1, keepdims=True) + bfc
    else:
        out = lax.dot_general(h, wfc, (((1,), (1,)), ((), ())),
                              preferred_element_type=jnp.float32) + bfc
    out_ref[...] = out.astype(out_ref.dtype)


def rnn_forecast(x, w_ih, w_hh, b_ih, b_hh, w_fc, b_fc):
    """x: (B, T, I) batch_first, like the PyTorch module. Returns (B, O)."""
    B, T, I = x.shape
    H = w_ih.shape[0]
    O = w_fc.shape[0]
    assert I <= H and O <= H, "parameter packing assumes I, O <= H"

    # ---- Pack the five small parameter tensors into one (rows, H) f32 slab -----
    # One parameter DMA instead of five; offsets are multiples of 8 so the
    # in-kernel slices stay sublane-aligned.
    off_whh = 0
    off_wih = _round_up(H, 8)
    off_b = off_wih + _round_up(I, 8)
    off_wfc = off_b + 8
    off_bfc = off_wfc + _round_up(O, 8)
    rows = off_bfc + 8
    params = jnp.zeros((rows, H), jnp.float32)
    params = params.at[off_whh:off_whh + H, :].set(jnp.transpose(w_hh))   # W_hh^T
    params = params.at[off_wih:off_wih + I, :].set(jnp.transpose(w_ih))   # W_ih^T
    params = params.at[off_b, :].set(b_ih + b_hh)                         # fused bias
    params = params.at[off_wfc:off_wfc + O, :].set(w_fc)
    params = params.at[off_bfc, :O].set(b_fc)

    # ---- Batch-block grid: pad B to a sublane multiple; cap the block so the ----
    # ---- time-major (T, Bb, H) scratch stays well inside scoped VMEM ------------
    Bp = _round_up(max(B, 8), 8)
    max_bb_vmem = max(8, ((12 << 20) // (T * H * 4)) // 8 * 8)   # ~<=12 MiB scratch
    block_b = min(Bp, 256, max_bb_vmem)
    Bp = _round_up(Bp, block_b)
    num_blocks = Bp // block_b
    # TODO(synk): for very long T (block_b pinned at 8 still overflows VMEM) the
    # sequence should additionally be chunked along T with h carried in scratch.

    x_in = x.reshape(B, T) if I == 1 else x
    if Bp != B:
        pad = [(0, Bp - B)] + [(0, 0)] * (x_in.ndim - 1)
        x_in = jnp.pad(x_in, pad)

    if I == 1:
        x_spec = pl.BlockSpec((block_b, T), lambda i: (i, 0))
    else:
        x_spec = pl.BlockSpec((block_b, T, I), lambda i: (i, 0, 0))
    p_spec = pl.BlockSpec((rows, H), lambda i: (0, 0))
    out_spec = pl.BlockSpec((block_b, O), lambda i: (i, 0))

    kernel = functools.partial(
        rnn_kernel, input_size=I, hidden_size=H, output_size=O,
        offsets=(off_whh, off_wih, off_b, off_wfc, off_bfc))

    out = pl.pallas_call(
        kernel,
        out_shape=jax.ShapeDtypeStruct((Bp, O), x.dtype),
        grid=(num_blocks,),
        in_specs=[x_spec, p_spec],
        out_specs=out_spec,
        scratch_shapes=[pltpu.VMEM((T, block_b, H), jnp.float32)],
        compiler_params=pltpu.CompilerParams(
            # Independent batch blocks: shard across TensorCores on v7x.
            dimension_semantics=("parallel",)),
    )(x_in, params)
    return out[:B]


def rnn_forecast_ref(x, w_ih, w_hh, b_ih, b_hh, w_fc, b_fc):
    """Pure-JAX reference matching nn.RNN(batch_first=True) + fc."""
    B = x.shape[0]
    H = w_ih.shape[0]
    h0 = jnp.zeros((B, H), jnp.float32)

    def step(h, x_t):
        h_new = jnp.tanh(x_t @ w_ih.T + b_ih + h @ w_hh.T + b_hh)
        return h_new, None

    h_last, _ = lax.scan(step, h0, jnp.transpose(x, (1, 0, 2)))
    return h_last @ w_fc.T + b_fc


if __name__ == "__main__":
    # Module config: input_size=1, hidden_size=64, num_layers=1, output_size=1
    B, T, I, H, O = 2, 8, 1, 64, 1

    key = jax.random.PRNGKey(0)
    ks = jax.random.split(key, 7)
    bound = 1.0 / jnp.sqrt(jnp.float32(H))   # PyTorch default init range

    x = jax.random.normal(ks[0], (B, T, I), dtype=jnp.float32)
    w_ih = jax.random.uniform(ks[1], (H, I), jnp.float32, -bound, bound)
    w_hh = jax.random.uniform(ks[2], (H, H), jnp.float32, -bound, bound)
    b_ih = jax.random.uniform(ks[3], (H,), jnp.float32, -bound, bound)
    b_hh = jax.random.uniform(ks[4], (H,), jnp.float32, -bound, bound)
    w_fc = jax.random.uniform(ks[5], (O, H), jnp.float32, -bound, bound)
    b_fc = jax.random.uniform(ks[6], (O,), jnp.float32, -bound, bound)

    out = rnn_forecast(x, w_ih, w_hh, b_ih, b_hh, w_fc, b_fc)
    out = jax.block_until_ready(out)

    ref = rnn_forecast_ref(x, w_ih, w_hh, b_ih, b_hh, w_fc, b_fc)
    assert out.shape == (B, O), out.shape
    assert jnp.allclose(out, ref, atol=1e-5, rtol=1e-5), (out, ref)

    print("KERNEL_OK")
</pallas_src>

<mosaic_0001>
module attributes {stable_mosaic.version = 11 : i64} {
  func.func @rnn_kernel(%arg0: i32, %arg1: memref<8x8xf32, #tpu.memory_space<vmem>>, %arg2: memref<96x64xf32, #tpu.memory_space<vmem>>, %arg3: memref<8x1xf32, #tpu.memory_space<vmem>>, %arg4: memref<8x8x64xf32, #tpu.memory_space<vmem>>) attributes {dimension_semantics = [#tpu.dimension_semantics<parallel>], iteration_bounds = array<i64: 1>, scalar_prefetch = 0 : i64, scratch_operands = 1 : i64, tpu.core_type = #tpu.core_type<tc>, window_params = [{transform_indices = @transform_0, window_bounds = array<i64: 8, 8>}, {pipeline_mode = #tpu.pipeline_mode<synchronous>, transform_indices = @transform_1, window_bounds = array<i64: 96, 64>}, {transform_indices = @transform_2, window_bounds = array<i64: 8, 1>}]} {
    %c0 = arith.constant 0 : index
    %c0_0 = arith.constant 0 : index
    %0 = vector.load %arg2[%c0, %c0_0] : memref<96x64xf32, #tpu.memory_space<vmem>>, vector<64x64xf32>
    %c72 = arith.constant 72 : index
    %c0_1 = arith.constant 0 : index
    %1 = vector.load %arg2[%c72, %c0_1] : memref<96x64xf32, #tpu.memory_space<vmem>>, vector<1x64xf32>
    %c0_2 = arith.constant 0 : index
    %c0_3 = arith.constant 0 : index
    %2 = vector.load %arg1[%c0_2, %c0_3] : memref<8x8xf32, #tpu.memory_space<vmem>>, vector<8x8xf32>
    %3 = tpu.transpose %2, [1, 0] : vector<8x8xf32> -> vector<8x8xf32>
    %c64 = arith.constant 64 : index
    %c0_4 = arith.constant 0 : index
    %4 = vector.load %arg2[%c64, %c0_4] : memref<96x64xf32, #tpu.memory_space<vmem>>, vector<1x64xf32>
    %5 = vector.shape_cast %3 : vector<8x8xf32> to vector<8x8x1xf32>
    %6 = vector.shape_cast %4 : vector<1x64xf32> to vector<1x1x64xf32>
    %7 = vector.broadcast %5 : vector<8x8x1xf32> to vector<8x8x64xf32>
    %8 = vector.broadcast %6 : vector<1x1x64xf32> to vector<8x8x64xf32>
    %9 = arith.mulf %7, %8 : vector<8x8x64xf32>
    %10 = vector.shape_cast %1 : vector<1x64xf32> to vector<1x1x64xf32>
    %11 = vector.broadcast %10 : vector<1x1x64xf32> to vector<8x8x64xf32>
    %12 = arith.addf %9, %11 : vector<8x8x64xf32>
    %c0_5 = arith.constant 0 : index
    %c0_6 = arith.constant 0 : index
    %c0_7 = arith.constant 0 : index
    %13 = vector.load %arg4[%c0_5, %c0_6, %c0_7] : memref<8x8x64xf32, #tpu.memory_space<vmem>>, vector<8x8x64xf32>
    tpu.vector_store %arg4[%c0_5, %c0_6, %c0_7], %12 {strides = array<i32>} : memref<8x8x64xf32, #tpu.memory_space<vmem>>, vector<8x8x64xf32>,
    %c0_8 = arith.constant 0 : index
    %c0_9 = arith.constant 0 : index
    %c0_10 = arith.constant 0 : index
    %14 = vector.load %arg4[%c0_8, %c0_9, %c0_10] : memref<8x8x64xf32, #tpu.memory_space<vmem>>, vector<1x8x64xf32>
    %15 = vector.shape_cast %14 : vector<1x8x64xf32> to vector<8x64xf32>
    %16 = math.tanh %15 : vector<8x64xf32>
    %c1 = arith.constant 1 : index
    %c0_11 = arith.constant 0 : index
    %c0_12 = arith.constant 0 : index
    %17 = vector.load %arg4[%c1, %c0_11, %c0_12] : memref<8x8x64xf32, #tpu.memory_space<vmem>>, vector<1x8x64xf32>
    %18 = vector.shape_cast %17 : vector<1x8x64xf32> to vector<8x64xf32>
    %cst = arith.constant dense<0.000000e+00> : vector<8x64xf32>
    %19 = tpu.matmul %16, %0, %cst {dimension_numbers = #tpu.dot_dimension_numbers<[1], [0], [0], [1], [0, 0, 1, 1], [], []>} : vector<8x64xf32>, vector<64x64xf32>, vector<8x64xf32> -> vector<8x64xf32>
    %20 = arith.addf %18, %19 : vector<8x64xf32>
    %21 = math.tanh %20 : vector<8x64xf32>
    %c2 = arith.constant 2 : index
    %c0_13 = arith.constant 0 : index
    %c0_14 = arith.constant 0 : index
    %22 = vector.load %arg4[%c2, %c0_13, %c0_14] : memref<8x8x64xf32, #tpu.memory_space<vmem>>, vector<1x8x64xf32>
    %23 = vector.shape_cast %22 : vector<1x8x64xf32> to vector<8x64xf32>
    %cst_15 = arith.constant dense<0.000000e+00> : vector<8x64xf32>
    %24 = tpu.matmul %21, %0, %cst_15 {dimension_numbers = #tpu.dot_dimension_numbers<[1], [0], [0], [1], [0, 0, 1, 1], [], []>} : vector<8x64xf32>, vector<64x64xf32>, vector<8x64xf32> -> vector<8x64xf32>
    %25 = arith.addf %23, %24 : vector<8x64xf32>
    %26 = math.tanh %25 : vector<8x64xf32>
    %c3 = arith.constant 3 : index
    %c0_16 = arith.constant 0 : index
    %c0_17 = arith.constant 0 : index
    %27 = vector.load %arg4[%c3, %c0_16, %c0_17] : memref<8x8x64xf32, #tpu.memory_space<vmem>>, vector<1x8x64xf32>
    %28 = vector.shape_cast %27 : vector<1x8x64xf32> to vector<8x64xf32>
    %cst_18 = arith.constant dense<0.000000e+00> : vector<8x64xf32>
    %29 = tpu.matmul %26, %0, %cst_18 {dimension_numbers = #tpu.dot_dimension_numbers<[1], [0], [0], [1], [0, 0, 1, 1], [], []>} : vector<8x64xf32>, vector<64x64xf32>, vector<8x64xf32> -> vector<8x64xf32>
    %30 = arith.addf %28, %29 : vector<8x64xf32>
    %31 = math.tanh %30 : vector<8x64xf32>
    %c4 = arith.constant 4 : index
    %c0_19 = arith.constant 0 : index
    %c0_20 = arith.constant 0 : index
    %32 = vector.load %arg4[%c4, %c0_19, %c0_20] : memref<8x8x64xf32, #tpu.memory_space<vmem>>, vector<1x8x64xf32>
    %33 = vector.shape_cast %32 : vector<1x8x64xf32> to vector<8x64xf32>
    %cst_21 = arith.constant dense<0.000000e+00> : vector<8x64xf32>
    %34 = tpu.matmul %31, %0, %cst_21 {dimension_numbers = #tpu.dot_dimension_numbers<[1], [0], [0], [1], [0, 0, 1, 1], [], []>} : vector<8x64xf32>, vector<64x64xf32>, vector<8x64xf32> -> vector<8x64xf32>
    %35 = arith.addf %33, %34 : vector<8x64xf32>
    %36 = math.tanh %35 : vector<8x64xf32>
    %c5 = arith.constant 5 : index
    %c0_22 = arith.constant 0 : index
    %c0_23 = arith.constant 0 : index
    %37 = vector.load %arg4[%c5, %c0_22, %c0_23] : memref<8x8x64xf32, #tpu.memory_space<vmem>>, vector<1x8x64xf32>
    %38 = vector.shape_cast %37 : vector<1x8x64xf32> to vector<8x64xf32>
    %cst_24 = arith.constant dense<0.000000e+00> : vector<8x64xf32>
    %39 = tpu.matmul %36, %0, %cst_24 {dimension_numbers = #tpu.dot_dimension_numbers<[1], [0], [0], [1], [0, 0, 1, 1], [], []>} : vector<8x64xf32>, vector<64x64xf32>, vector<8x64xf32> -> vector<8x64xf32>
    %40 = arith.addf %38, %39 : vector<8x64xf32>
    %41 = math.tanh %40 : vector<8x64xf32>
    %c6 = arith.constant 6 : index
    %c0_25 = arith.constant 0 : index
    %c0_26 = arith.constant 0 : index
    %42 = vector.load %arg4[%c6, %c0_25, %c0_26] : memref<8x8x64xf32, #tpu.memory_space<vmem>>, vector<1x8x64xf32>
    %43 = vector.shape_cast %42 : vector<1x8x64xf32> to vector<8x64xf32>
    %cst_27 = arith.constant dense<0.000000e+00> : vector<8x64xf32>
    %44 = tpu.matmul %41, %0, %cst_27 {dimension_numbers = #tpu.dot_dimension_numbers<[1], [0], [0], [1], [0, 0, 1, 1], [], []>} : vector<8x64xf32>, vector<64x64xf32>, vector<8x64xf32> -> vector<8x64xf32>
    %45 = arith.addf %43, %44 : vector<8x64xf32>
    %46 = math.tanh %45 : vector<8x64xf32>
    %c7 = arith.constant 7 : index
    %c0_28 = arith.constant 0 : index
    %c0_29 = arith.constant 0 : index
    %47 = vector.load %arg4[%c7, %c0_28, %c0_29] : memref<8x8x64xf32, #tpu.memory_space<vmem>>, vector<1x8x64xf32>
    %48 = vector.shape_cast %47 : vector<1x8x64xf32> to vector<8x64xf32>
    %cst_30 = arith.constant dense<0.000000e+00> : vector<8x64xf32>
    %49 = tpu.matmul %46, %0, %cst_30 {dimension_numbers = #tpu.dot_dimension_numbers<[1], [0], [0], [1], [0, 0, 1, 1], [], []>} : vector<8x64xf32>, vector<64x64xf32>, vector<8x64xf32> -> vector<8x64xf32>
    %50 = arith.addf %48, %49 : vector<8x64xf32>
    %51 = math.tanh %50 : vector<8x64xf32>
    %c80 = arith.constant 80 : index
    %c0_31 = arith.constant 0 : index
    %52 = vector.load %arg2[%c80, %c0_31] : memref<96x64xf32, #tpu.memory_space<vmem>>, vector<1x64xf32>
    %c88 = arith.constant 88 : index
    %c0_32 = arith.constant 0 : index
    %53 = vector.load %arg2[%c88, %c0_32] : memref<96x64xf32, #tpu.memory_space<vmem>>, vector<1x64xf32>
    %54 = vector.extract_strided_slice %53 {offsets = [0, 0], sizes = [1, 1], strides = [1, 1]} : vector<1x64xf32> to vector<1x1xf32>
    %55 = vector.broadcast %52 : vector<1x64xf32> to vector<8x64xf32>
    %56 = arith.mulf %51, %55 : vector<8x64xf32>
    %cst_33 = arith.constant dense<0.000000e+00> : vector<8xf32>
    %57 = vector.multi_reduction <add>, %56, %cst_33 [1] : vector<8x64xf32> to vector<8xf32>
    %58 = vector.shape_cast %57 : vector<8xf32> to vector<8x1xf32>
    %59 = vector.broadcast %54 : vector<1x1xf32> to vector<8x1xf32>
    %60 = arith.addf %58, %59 : vector<8x1xf32>
    %c0_34 = arith.constant 0 : index
    %c0_35 = arith.constant 0 : index
    %61 = vector.load %arg3[%c0_34, %c0_35] : memref<8x1xf32, #tpu.memory_space<vmem>>, vector<8x1xf32>
    tpu.vector_store %arg3[%c0_34, %c0_35], %60 {strides = array<i32>} : memref<8x1xf32, #tpu.memory_space<vmem>>, vector<8x1xf32>,
    return
  }
  func.func @transform_0(%arg0: i32) -> (i32, i32) {
    %c0_i32 = arith.constant 0 : i32
    %c0_i32_0 = arith.constant 0 : i32
    return %arg0, %c0_i32 : i32, i32
  }
  func.func @transform_1(%arg0: i32) -> (i32, i32) {
    %c0_i32 = arith.constant 0 : i32
    %c0_i32_0 = arith.constant 0 : i32
    %c0_i32_1 = arith.constant 0 : i32
    return %c0_i32, %c0_i32_0 : i32, i32
  }
  func.func @transform_2(%arg0: i32) -> (i32, i32) {
    %c0_i32 = arith.constant 0 : i32
    %c0_i32_0 = arith.constant 0 : i32
    return %arg0, %c0_i32 : i32, i32
  }
}

</mosaic_0001>

<bundles_post_ra>
// kernel: tpu_custom_call.1
= control target key start
LH: loop header
LB: loop body
LE: loop exit
PB: predicated region body
PF: predicated region fallthrough
CT: control target
= control target key end

     0   :  { %v54_v1 = vlaneseq  ;;  %v930_v9 = vmov 0.0   ;;  %vm931_vm0 = vmmov 0   ;;  %vm134_vm1 = vcmask 523264   ;;  %s1167_s0 = inlined_call_operand.vmem [shape: f32[8,8], index: 0, kind: input, shape index: {}]   ;;  %s1168_s1 = inlined_call_operand.vmem [shape: f32[96,64], index: 1, kind: input, shape index: {}]   ;;  %s1169_s2 = inlined_call_operand.vmem [shape: f32[8,1], index: 2, kind: output, shape index: {}]  }
   0x1   :  { %v20_v0 = vld [vmem:[%s1167_s0] sm:$0xff]  ;;  %779 = vmatprep.subr.mxu0 %v930_v9  ;;  %v963_v10 = vld [vmem:[%s1168_s1 + $0x38] sm:$0xff]  ;;  %v969_v11 = vld [vmem:[%s1168_s1 + $0x30] sm:$0xff]  ;;  %798 = vmatprep.subr.mxu1 %v930_v9  ;;  %vm699_vm2 = vcmask 7168  }
   0x2   :  { %21 = vxpose.xlu0.b32.start.end [1/1] (short) (narrow) %v20_v0, 8  ;;  %v950_v2 = vshrl.u32 %v54_v1, 7  ;;  %780 = vmatpush3.msra.mxu0 %v963_v10  ;;  %v979_v14 = vld [vmem:[%s1168_s1 + $0x28] sm:$0xff]  ;;  %v988_v15 = vld [vmem:[%s1168_s1 + $0x20] sm:$0xff]  ;;  %v998_v18 = vld [vmem:[%s1168_s1 + $0x18] sm:$0xff] }
   0x3   :  { %781 = vmatprep.subr.mxu0 %v930_v9  ;;  %799 = vmatpush3.msra.mxu1 %v963_v10  ;;  %v1007_v19 = vld [vmem:[%s1168_s1 + $0x10] sm:$0xff]  ;;  %v1017_v22 = vld [vmem:[%s1168_s1 + $0x8] sm:$0xff]  ;;  %v1026_v23 = vld [vmem:[%s1168_s1] sm:$0xff] }
   0x4   :  { %v63_v3 = vsub.s32 1, %v950_v2  ;;  %v56_v4 = vsub.s32 0, %v950_v2  ;;  %v70_v8 = vsub.s32 2, %v950_v2  ;;  %v77_v13 = vsub.s32 3, %v950_v2  ;;  %782 = vmatpush3.msra.mxu0 %v969_v11  ;;  %800 = vmatprep.subr.mxu1 %v930_v9  ;;  %v705_v29 = vld [vmem:[%s1168_s1 + $0x40] ss:$0 sm:$0xff] }
   0x5   :  { %783 = vmatprep.subr.mxu0 %v930_v9  ;;  %801 = vmatpush3.msra.mxu1 %v969_v11  ;;  %v84_v17 = vsub.s32 4, %v950_v2  ;;  %v91_v21 = vsub.s32 5, %v950_v2  ;;  %v98_v25 = vsub.s32 6, %v950_v2  ;;  %v105_v27 = vsub.s32 7, %v950_v2  ;;  %v706_v30 = vld [vmem:[%s1168_s1 + $0x48] ss:$0 sm:$0xff] }
   0x6   :  { %784 = vmatpush3.msra.mxu0 %v979_v14  ;;  %802 = vmatprep.subr.mxu1 %v930_v9 }
   0x7   :  { %785 = vmatprep.subr.mxu0 %v930_v9  ;;  %803 = vmatpush3.msra.mxu1 %v979_v14 }
   0x8   :  { %786 = vmatpush3.msra.mxu0 %v988_v15  ;;  %804 = vmatprep.subr.mxu1 %v930_v9 }
   0x9   :  { %787 = vmatprep.subr.mxu0 %v930_v9  ;;  %805 = vmatpush3.msra.mxu1 %v988_v15 }
   0xa   :  { %788 = vmatpush3.msra.mxu0 %v998_v18  ;;  %806 = vmatprep.subr.mxu1 %v930_v9 }
   0xb   :  { %789 = vmatprep.subr.mxu0 %v930_v9  ;;  %795 = vmatprep.mubr.msk.f32.mxu0 %vm931_vm0, %v930_v9 }
   0xc   :  { %790 = vmatpush3.msra.mxu0 %v1007_v19  ;;  %807 = vmatpush3.msra.mxu1 %v998_v18 }
   0xd   :  { %791 = vmatprep.subr.mxu0 %v930_v9  ;;  %808 = vmatprep.subr.mxu1 %v930_v9 }
   0xe   :  { %792 = vmatpush3.msra.mxu0 %v1017_v22  ;;  %814 = vmatprep.mubr.msk.f32.mxu1 %vm931_vm0, %v930_v9 }
   0xf   :  { %793 = vmatprep.subr.mxu0 %v930_v9  ;;  %809 = vmatpush3.msra.mxu1 %v1007_v19 }
  0x10   :  { %794 = vmatpush3.msra.mxu0 %v1026_v23  ;;  %810 = vmatprep.subr.mxu1 %v930_v9 }
  0x11   :  { %817 = vmatprep.subr.mxu0 %v930_v9  ;;  %811 = vmatpush3.msra.mxu1 %v1017_v22 }
  0x12   :  { %812 = vmatprep.subr.mxu1 %v930_v9 }
  0x13   :  { %813 = vmatpush3.msra.mxu1 %v1026_v23 }
  0x14   :  { %836 = vmatprep.subr.mxu1 %v930_v9 }
  0x7e   :  { %v954_v5 = vpop.trf.xlu0 }
  0x7f   :  { %v64_v6 = vrot.slane %v954_v5, %v63_v3  ;;  %v57_v7 = vrot.slane %v954_v5, %v56_v4  ;;  %v71_v12 = vrot.slane %v954_v5, %v70_v8  ;;  %v78_v16 = vrot.slane %v954_v5, %v77_v13 }
  0x80   :  { %v85_v20 = vrot.slane %v954_v5, %v84_v17  ;;  %v92_v24 = vrot.slane %v954_v5, %v91_v21  ;;  %v99_v26 = vrot.slane %v954_v5, %v98_v25  ;;  %v106_v28 = vrot.slane %v954_v5, %v105_v27  ;;  %v714_v27 = vld [vmem:[%s1168_s1 + $0x50] ss:$0 sm:$0xff] }
  0x81   :  { %66 = vbcast.lane.b32.xlu1 %v64_v6, 256  ;;  %59 = vbcast.lane.b32.xlu0 %v57_v7, 256 }
  0x85   :  { %73 = vbcast.lane.b32.xlu1 %v71_v12, 256 }
  0x89   :  { %80 = vbcast.lane.b32.xlu1 %v78_v16, 256 }
  0x8d   :  { %87 = vbcast.lane.b32.xlu1 %v85_v20, 256 }
  0x91   :  { %94 = vbcast.lane.b32.xlu1 %v92_v24, 256 }
  0x95   :  { %101 = vbcast.lane.b32.xlu1 %v99_v26, 256 }
  0x99   :  { %108 = vbcast.lane.b32.xlu1 %v106_v28, 256 }
  0xf3   :  { %v67_v31 = vpop.permute.xlu1 %66  ;;  %v60_v32 = vpop.permute.xlu0 %59 }
  0xf4   :  { %v115_v33 = vmul.f32 %v705_v29, %v67_v31  ;;  %v114_v34 = vmul.f32 %v705_v29, %v60_v32  ;;  %v715_v31 = vld [vmem:[%s1168_s1 + $0x58] ss:$0 sm:$0xff] }
  0xf6   :  { %v127_v35 = vadd.f32 %v706_v30, %v115_v33  ;;  %v126_v36 = vadd.f32 %v706_v30, %v114_v34 }
  0xf7   :  { %v74_v37 = vpop.permute.xlu1 %73 }
  0xf8   :  { %136 = vst.msk [vmem:[#allocation2 + $0x8] sm:$0xff] %vm134_vm1, %v127_v35  ;;  %135 = vst.msk [vmem:[#allocation2] sm:$0xff] %vm134_vm1, %v126_v36  ;;  %v116_v38 = vmul.f32 %v705_v29, %v74_v37 }
  0xfa   :  { %v128_v39 = vadd.f32 %v706_v30, %v116_v38 }
  0xfb   :  { %v81_v40 = vpop.permute.xlu1 %80 }
  0xfc   :  { %137 = vst.msk [vmem:[#allocation2 + $0x10] sm:$0xff] %vm134_vm1, %v128_v39  ;;  %v117_v41 = vmul.f32 %v705_v29, %v81_v40 }
  0xfe   :  { %v129_v42 = vadd.f32 %v706_v30, %v117_v41 }
  0xff   :  { %v143_v43 = vld [vmem:[#allocation2] sm:$0xff]  ;;  %v88_v44 = vpop.permute.xlu1 %87  ;;  %v146_v57 = vld [vmem:[#allocation2 + $0x8] sm:$0xff] }
 0x100   :  { %914 = vtanh.f32 %v143_v43  ;;  %138 = vst.msk [vmem:[#allocation2 + $0x18] sm:$0xff] %vm134_vm1, %v129_v42  ;;  %v118_v45 = vmul.f32 %v705_v29, %v88_v44 }
 0x102   :  { %v130_v46 = vadd.f32 %v706_v30, %v118_v45 }
 0x103   :  { %v95_v47 = vpop.permute.xlu1 %94  ;;  %v223_v62 = vld [vmem:[#allocation2 + $0x10] sm:$0xff] }
 0x104   :  { %139 = vst.msk [vmem:[#allocation2 + $0x20] sm:$0xff] %vm134_vm1, %v130_v46  ;;  %v119_v48 = vmul.f32 %v705_v29, %v95_v47 }
 0x106   :  { %v131_v49 = vadd.f32 %v706_v30, %v119_v48 }
 0x107   :  { %v102_v50 = vpop.permute.xlu1 %101  ;;  %v300_v3 = vld [vmem:[#allocation2 + $0x18] sm:$0xff] }
 0x108   :  { %140 = vst.msk [vmem:[#allocation2 + $0x28] sm:$0xff] %vm134_vm1, %v131_v49  ;;  %v120_v51 = vmul.f32 %v705_v29, %v102_v50 }
 0x10a   :  { %v132_v52 = vadd.f32 %v706_v30, %v120_v51 }
 0x10b   :  { %v109_v53 = vpop.permute.xlu1 %108  ;;  %v377_v8 = vld [vmem:[#allocation2 + $0x20] sm:$0xff] }
 0x10c   :  { %141 = vst.msk [vmem:[#allocation2 + $0x30] sm:$0xff] %vm134_vm1, %v132_v52  ;;  %v121_v54 = vmul.f32 %v705_v29, %v109_v53 }
 0x10d   :  { %v915_v55 = vpop.eup %914 }
 0x10e   :  { %v133_v56 = vadd.f32 %v706_v30, %v121_v54  ;;  %796 = vmatmul.mubr.msk.f32.vlgmr.msra.gmra.mxu0 %vm134_vm1, %v915_v55 }
 0x10f   :  { %818 = vmatpush3.msra.mxu0 %v963_v10  ;;  %833 = vmatprep.mubr.msk.f32.mxu0 %vm931_vm0, %v930_v9 }
 0x110   :  { %142 = vst.msk [vmem:[#allocation2 + $0x38] sm:$0xff] %vm134_vm1, %v133_v56  ;;  %819 = vmatprep.subr.mxu0 %v930_v9 }
 0x111   :  { %820 = vmatpush3.msra.mxu0 %v969_v11 }
 0x112   :  { %821 = vmatprep.subr.mxu0 %v930_v9 }
 0x113   :  { %822 = vmatpush3.msra.mxu0 %v979_v14 }
 0x114   :  { %823 = vmatprep.subr.mxu0 %v930_v9 }
 0x115   :  { %824 = vmatpush3.msra.mxu0 %v988_v15 }
 0x116   :  { %825 = vmatprep.subr.mxu0 %v930_v9 }
 0x117   :  { %826 = vmatpush3.msra.mxu0 %v998_v18 }
 0x118   :  { %827 = vmatprep.subr.mxu0 %v930_v9 }
 0x119   :  { %828 = vmatpush3.msra.mxu0 %v1007_v19 }
 0x11a   :  { %829 = vmatprep.subr.mxu0 %v930_v9 }
 0x11b   :  { %830 = vmatpush3.msra.mxu0 %v1017_v22 }
 0x11c   :  { %831 = vmatprep.subr.mxu0 %v930_v9 }
 0x11d   :  { %832 = vmatpush3.msra.mxu0 %v1026_v23 }
 0x11e   :  { %855 = vmatprep.subr.mxu0 %v930_v9 }
 0x1ce   :  { %v216_v58 = vpop.f32.mrf.mxu0 }
 0x1cf   :  { %v220_v59 = vadd.f32 %v216_v58, %v146_v57 }
 0x1d0   :  { %v797_v60 = vpop.f32.mrf.mxu0 }
 0x1d1   :  { %916 = vtanh.f32 %v220_v59 }
 0x1de   :  { %v917_v61 = vpop.eup %916 }
 0x1df   :  { %815 = vmatmul.mubr.msk.f32.vlgmr.msra.gmra.mxu1 %vm134_vm1, %v917_v61 }
 0x1e0   :  { %837 = vmatpush3.msra.mxu1 %v963_v10  ;;  %852 = vmatprep.mubr.msk.f32.mxu1 %vm931_vm0, %v930_v9 }
 0x1e1   :  { %838 = vmatprep.subr.mxu1 %v930_v9 }
 0x1e2   :  { %839 = vmatpush3.msra.mxu1 %v969_v11 }
 0x1e3   :  { %840 = vmatprep.subr.mxu1 %v930_v9 }
 0x1e4   :  { %841 = vmatpush3.msra.mxu1 %v979_v14 }
 0x1e5   :  { %842 = vmatprep.subr.mxu1 %v930_v9 }
 0x1e6   :  { %843 = vmatpush3.msra.mxu1 %v988_v15 }
 0x1e7   :  { %844 = vmatprep.subr.mxu1 %v930_v9 }
 0x1e8   :  { %845 = vmatpush3.msra.mxu1 %v998_v18 }
 0x1e9   :  { %846 = vmatprep.subr.mxu1 %v930_v9 }
 0x1ea   :  { %847 = vmatpush3.msra.mxu1 %v1007_v19 }
 0x1eb   :  { %848 = vmatprep.subr.mxu1 %v930_v9 }
 0x1ec   :  { %849 = vmatpush3.msra.mxu1 %v1017_v22 }
 0x1ed   :  { %850 = vmatprep.subr.mxu1 %v930_v9 }
 0x1ee   :  { %851 = vmatpush3.msra.mxu1 %v1026_v23 }
 0x1ef   :  { %874 = vmatprep.subr.mxu1 %v930_v9 }
 0x29f   :  { %v293_v63 = vpop.f32.mrf.mxu1 }
 0x2a0   :  { %v297_v0 = vadd.f32 %v293_v63, %v223_v62 }
 0x2a1   :  { %v816_v1 = vpop.f32.mrf.mxu1 }
 0x2a2   :  { %918 = vtanh.f32 %v297_v0 }
 0x2af   :  { %v919_v2 = vpop.eup %918 }
 0x2b0   :  { %834 = vmatmul.mubr.msk.f32.vlgmr.msra.gmra.mxu0 %vm134_vm1, %v919_v2 }
 0x2b1   :  { %856 = vmatpush3.msra.mxu0 %v963_v10  ;;  %871 = vmatprep.mubr.msk.f32.mxu0 %vm931_vm0, %v930_v9 }
 0x2b2   :  { %857 = vmatprep.subr.mxu0 %v930_v9 }
 0x2b3   :  { %858 = vmatpush3.msra.mxu0 %v969_v11 }
 0x2b4   :  { %859 = vmatprep.subr.mxu0 %v930_v9 }
 0x2b5   :  { %860 = vmatpush3.msra.mxu0 %v979_v14 }
 0x2b6   :  { %861 = vmatprep.subr.mxu0 %v930_v9 }
 0x2b7   :  { %862 = vmatpush3.msra.mxu0 %v988_v15 }
 0x2b8   :  { %863 = vmatprep.subr.mxu0 %v930_v9 }
 0x2b9   :  { %864 = vmatpush3.msra.mxu0 %v998_v18 }
 0x2ba   :  { %865 = vmatprep.subr.mxu0 %v930_v9 }
 0x2bb   :  { %866 = vmatpush3.msra.mxu0 %v1007_v19 }
 0x2bc   :  { %867 = vmatprep.subr.mxu0 %v930_v9 }
 0x2bd   :  { %868 = vmatpush3.msra.mxu0 %v1017_v22 }
 0x2be   :  { %869 = vmatprep.subr.mxu0 %v930_v9 }
 0x2bf   :  { %870 = vmatpush3.msra.mxu0 %v1026_v23 }
 0x2c0   :  { %893 = vmatprep.subr.mxu0 %v930_v9 }
 0x370   :  { %v370_v4 = vpop.f32.mrf.mxu0 }
 0x371   :  { %v374_v5 = vadd.f32 %v370_v4, %v300_v3 }
 0x372   :  { %v835_v6 = vpop.f32.mrf.mxu0 }
 0x373   :  { %920 = vtanh.f32 %v374_v5 }
 0x380   :  { %v921_v7 = vpop.eup %920 }
 0x381   :  { %853 = vmatmul.mubr.msk.f32.vlgmr.msra.gmra.mxu1 %vm134_vm1, %v921_v7 }
 0x382   :  { %875 = vmatpush3.msra.mxu1 %v963_v10  ;;  %890 = vmatprep.mubr.msk.f32.mxu1 %vm931_vm0, %v930_v9 }
 0x383   :  { %876 = vmatprep.subr.mxu1 %v930_v9 }
 0x384   :  { %877 = vmatpush3.msra.mxu1 %v969_v11 }
 0x385   :  { %878 = vmatprep.subr.mxu1 %v930_v9 }
 0x386   :  { %879 = vmatpush3.msra.mxu1 %v979_v14 }
 0x387   :  { %880 = vmatprep.subr.mxu1 %v930_v9 }
 0x388   :  { %881 = vmatpush3.msra.mxu1 %v988_v15 }
 0x389   :  { %882 = vmatprep.subr.mxu1 %v930_v9 }
 0x38a   :  { %883 = vmatpush3.msra.mxu1 %v998_v18 }
 0x38b   :  { %884 = vmatprep.subr.mxu1 %v930_v9 }
 0x38c   :  { %885 = vmatpush3.msra.mxu1 %v1007_v19 }
 0x38d   :  { %886 = vmatprep.subr.mxu1 %v930_v9 }
 0x38e   :  { %887 = vmatpush3.msra.mxu1 %v1017_v22 }
 0x38f   :  { %888 = vmatprep.subr.mxu1 %v930_v9 }
 0x390   :  { %889 = vmatpush3.msra.mxu1 %v1026_v23 }
 0x441   :  { %v447_v12 = vpop.f32.mrf.mxu1 }
 0x442   :  { %v451_v13 = vadd.f32 %v447_v12, %v377_v8 }
 0x443   :  { %v854_v16 = vpop.f32.mrf.mxu1 }
 0x444   :  { %922 = vtanh.f32 %v451_v13 }
 0x451   :  { %v923_v17 = vpop.eup %922 }
 0x452   :  { %872 = vmatmul.mubr.msk.f32.vlgmr.msra.gmra.mxu0 %vm134_vm1, %v923_v17 }
 0x453   :  { %894 = vmatpush3.msra.mxu0 %v963_v10  ;;  %909 = vmatprep.mubr.msk.f32.mxu0 %vm931_vm0, %v930_v9  ;;  %v454_v10 = vld [vmem:[#allocation2 + $0x28] sm:$0xff] }
 0x454   :  { %895 = vmatprep.subr.mxu0 %v930_v9 }
 0x455   :  { %896 = vmatpush3.msra.mxu0 %v969_v11 }
 0x456   :  { %897 = vmatprep.subr.mxu0 %v930_v9 }
 0x457   :  { %898 = vmatpush3.msra.mxu0 %v979_v14 }
 0x458   :  { %899 = vmatprep.subr.mxu0 %v930_v9 }
 0x459   :  { %900 = vmatpush3.msra.mxu0 %v988_v15 }
 0x45a   :  { %901 = vmatprep.subr.mxu0 %v930_v9 }
 0x45b   :  { %902 = vmatpush3.msra.mxu0 %v998_v18  ;;  %v531_v18 = vld [vmem:[#allocation2 + $0x30] sm:$0xff] }
 0x45c   :  { %903 = vmatprep.subr.mxu0 %v930_v9 }
 0x45d   :  { %904 = vmatpush3.msra.mxu0 %v1007_v19 }
 0x45e   :  { %905 = vmatprep.subr.mxu0 %v930_v9 }
 0x45f   :  { %906 = vmatpush3.msra.mxu0 %v1017_v22  ;;  %v608_v22 = vld [vmem:[#allocation2 + $0x38] sm:$0xff] }
 0x460   :  { %907 = vmatprep.subr.mxu0 %v930_v9 }
 0x461   :  { %908 = vmatpush3.msra.mxu0 %v1026_v23 }
 0x512   :  { %v524_v11 = vpop.f32.mrf.mxu0 }
 0x513   :  { %v528_v14 = vadd.f32 %v524_v11, %v454_v10 }
 0x514   :  { %v873_v15 = vpop.f32.mrf.mxu0 }
 0x515   :  { %924 = vtanh.f32 %v528_v14 }
 0x522   :  { %v925_v20 = vpop.eup %924 }
 0x523   :  { %891 = vmatmul.mubr.msk.f32.vlgmr.msra.gmra.mxu1 %vm134_vm1, %v925_v20 }
 0x5e3   :  { %v601_v21 = vpop.f32.mrf.mxu1 }
 0x5e4   :  { %v605_v24 = vadd.f32 %v601_v21, %v531_v18 }
 0x5e5   :  { %v892_v19 = vpop.f32.mrf.mxu1 }
 0x5e6   :  { %926 = vtanh.f32 %v605_v24 }
 0x5f3   :  { %v927_v25 = vpop.eup %926 }
 0x5f4   :  { %910 = vmatmul.mubr.msk.f32.vlgmr.msra.gmra.mxu0 %vm134_vm1, %v927_v25 }
 0x6b4   :  { %v678_v9 = vpop.f32.mrf.mxu0 }
 0x6b5   :  { %v682_v26 = vadd.f32 %v678_v9, %v608_v22 }
 0x6b6   :  { %v911_v23 = vpop.f32.mrf.mxu0 }
 0x6b7   :  { %928 = vtanh.f32 %v682_v26 }
 0x6c4   :  { %v929_v28 = vpop.eup %928 }
 0x6c5   :  { %v690_v29 = vmul.f32 %v929_v28, %v714_v27 }
 0x6c7   :  { %v691_v30 = vsel %vm134_vm1, %v690_v29, 0.0 }
 0x6c8   :  { %692 = vadd.xlane.f32.xlu1 %v691_v30 }
 0x751   :  { %v693_v32 = vpop.xlane.xlu1 %692 }
 0x752   :  { %v698_v33 = vadd.f32 %v715_v31, %v693_v32 }
 0x754   :  { %700 = vst.msk [vmem:[%s1169_s2] sm:$0xff] %vm699_vm2, %v698_v33 }

</bundles_post_ra>
